<compile_context>
chip_gen: v5e
topology: v5e:2x2
jax: 0.10.0
libtpu: 0.0.40
codegen_flags: <defaults>
</compile_context>

<pallas_src>
import jax
import jax.numpy as jnp
from jax import lax
from jax.experimental import pallas as pl
from jax.experimental.pallas import tpu as pltpu

FREQ_MASK_WIDTH = (0, 8)
TIME_MASK_WIDTH = (0, 10)


# --------------------------------------------------------------------------------------
# Kernel
# --------------------------------------------------------------------------------------
def fbank_aug_kernel(fpos_ref, flen_ref, tpos_ref, tlen_ref, x_ref, o_ref):
    """x_ref/o_ref: (Bb, F, TB) VMEM blocks; band params are (Bb, 1, 1) VMEM blocks."""
    Bb, F, TB = x_ref.shape
    t0 = pl.program_id(1) * TB                       # global time offset of this block
    # Tiny row/column iotas; broadcasting to (Bb, F, TB) happens inside the VPU ops.
    f_iota = lax.broadcasted_iota(jnp.int32, (1, F, 1), 1)
    t_iota = t0 + lax.broadcasted_iota(jnp.int32, (1, 1, TB), 2)
    fpos = fpos_ref[...]
    flen = flen_ref[...]
    tpos = tpos_ref[...]
    tlen = tlen_ref[...]
    freq_band = (f_iota >= fpos) & (f_iota < fpos + flen)       # (Bb, F, 1)
    time_band = (t_iota >= tpos) & (t_iota < tpos + tlen)       # (Bb, 1, TB)
    masked = freq_band | time_band                              # (Bb, F, TB)
    o_ref[...] = jnp.where(masked, jnp.zeros((), x_ref.dtype), x_ref[...])


# --------------------------------------------------------------------------------------
# Block sizing
# --------------------------------------------------------------------------------------
def _choose_blocks(B, F, T, itemsize, target_bytes=4 << 20, min_steps=8,
                   min_block_bytes=512 << 10):
    """Pick (Bb, TB): ~target-sized blocks, but at least `min_steps` grid steps on large
    inputs (keeps both v7x TensorCores fed with >=4 pipelined steps each) and never
    smaller than `min_block_bytes` (the ~0.35us per-step overhead would dominate)."""
    total = max(1, B * F * T * itemsize)
    tgt = max(min_block_bytes, min(target_bytes, pl.cdiv(total, min_steps)))
    per_sample = max(1, F * T * itemsize)
    if per_sample <= tgt:
        Bb = int(max(1, min(B, tgt // per_sample)))
        TB = T
    else:
        Bb = 1
        if T > 128:
            TB = int(max(128, (tgt // (F * itemsize)) // 128 * 128))  # lane-dense chunk
            TB = min(TB, T)
        else:
            TB = T
    return Bb, TB


# --------------------------------------------------------------------------------------
# Wrappers
# --------------------------------------------------------------------------------------
def fbank_aug_apply(x, freq_pos, freq_len, time_pos, time_len,
                    block_b=None, block_t=None):
    """Apply the (already sampled) per-sample freq/time band masks with Pallas."""
    B, F, T = x.shape
    Bb, TB = _choose_blocks(B, F, T, x.dtype.itemsize)
    if block_b is not None:
        Bb = block_b
    if block_t is not None:
        TB = block_t
    Bb = int(min(Bb, B))
    TB = int(min(TB, T))
    grid = (pl.cdiv(B, Bb), pl.cdiv(T, TB))

    def p3(v):  # (B,) int -> (B, 1, 1) int32, broadcast against the data block in-kernel
        return v.astype(jnp.int32).reshape(B, 1, 1)

    param_spec = pl.BlockSpec((Bb, 1, 1), lambda i, j: (i, 0, 0))
    data_spec = pl.BlockSpec((Bb, F, TB), lambda i, j: (i, 0, j))

    block_bytes = Bb * F * TB * x.dtype.itemsize
    # Enough for double-buffered in+out blocks with headroom; <= physical VMEM on all gens.
    vmem_limit = int(min(64 << 20, max(32 << 20, 6 * block_bytes)))

    return pl.pallas_call(
        fbank_aug_kernel,
        out_shape=jax.ShapeDtypeStruct((B, F, T), x.dtype),
        grid_spec=pltpu.PrefetchScalarGridSpec(
            num_scalar_prefetch=0,
            grid=grid,
            in_specs=[param_spec, param_spec, param_spec, param_spec, data_spec],
            out_specs=data_spec,
        ),
        compiler_params=pltpu.CompilerParams(
            dimension_semantics=("parallel", "parallel"),
            vmem_limit_bytes=vmem_limit,
        ),
    )(p3(freq_pos), p3(freq_len), p3(time_pos), p3(time_len), x)


def _sample_band_params(key, B, F, T, freq_mask_width=FREQ_MASK_WIDTH,
                        time_mask_width=TIME_MASK_WIDTH):
    """Same distributions as torch.randint in the reference: exclusive high; the
    position bound uses the batch-max sampled width."""
    k_tlen, k_tpos, k_flen, k_fpos = jax.random.split(key, 4)
    t_len = jax.random.randint(k_tlen, (B,), time_mask_width[0], time_mask_width[1])
    t_pos = jax.random.randint(k_tpos, (B,), 0, jnp.maximum(1, T - jnp.max(t_len)))
    f_len = jax.random.randint(k_flen, (B,), freq_mask_width[0], freq_mask_width[1])
    f_pos = jax.random.randint(k_fpos, (B,), 0, jnp.maximum(1, F - jnp.max(f_len)))
    return f_pos, f_len, t_pos, t_len


def fbank_aug(x, key, freq_mask_width=FREQ_MASK_WIDTH, time_mask_width=TIME_MASK_WIDTH):
    """Full FbankAug.forward: time mask (dim=2) then freq mask (dim=1); both bands are
    applied in one fused Pallas pass (zeroing order does not change the result)."""
    B, F, T = x.shape
    params = _sample_band_params(key, B, F, T, freq_mask_width, time_mask_width)
    out = fbank_aug_apply(x, *params)
    return out, params


# --------------------------------------------------------------------------------------
# Pure-JAX reference (same sampled parameters)
# --------------------------------------------------------------------------------------
def _reference(x, f_pos, f_len, t_pos, t_len):
    B, F, T = x.shape
    f_ar = jnp.arange(F)[None, :]
    t_ar = jnp.arange(T)[None, :]
    fmask = (f_ar >= f_pos[:, None]) & (f_ar < (f_pos + f_len)[:, None])   # (B, F)
    tmask = (t_ar >= t_pos[:, None]) & (t_ar < (t_pos + t_len)[:, None])   # (B, T)
    full = fmask[:, :, None] | tmask[:, None, :]                           # (B, F, T)
    return jnp.where(full, 0.0, x)


if __name__ == "__main__":
    root = jax.random.PRNGKey(0)
    k1, k2, k3, k4 = jax.random.split(root, 4)

    # --- case 1: small fbank batch, single-block grid --------------------------------
    B, F, T = 4, 16, 160
    x = jax.random.normal(k1, (B, F, T), dtype=jnp.float32)
    out, params = fbank_aug(x, k2)
    out = jax.block_until_ready(out)
    ref = _reference(x, *params)
    assert out.shape == (B, F, T)
    assert jnp.array_equal(out, ref), float(jnp.max(jnp.abs(out - ref)))

    # --- case 2: force a multi-step grid (lane-dense 128-wide T blocks, uneven T edge)
    B, F, T = 4, 16, 320
    x = jax.random.normal(k3, (B, F, T), dtype=jnp.float32)
    f_pos, f_len, t_pos, t_len = _sample_band_params(k4, B, F, T)
    out = fbank_aug_apply(x, f_pos, f_len, t_pos, t_len, block_b=2, block_t=128)
    out = jax.block_until_ready(out)
    ref = _reference(x, f_pos, f_len, t_pos, t_len)
    assert out.shape == (B, F, T)
    assert jnp.array_equal(out, ref), float(jnp.max(jnp.abs(out - ref)))

    print("KERNEL_OK")
</pallas_src>

<mosaic_0001>
module attributes {stable_mosaic.version = 11 : i64} {
  func.func @fbank_aug_kernel(%arg0: i32, %arg1: i32, %arg2: memref<4x1x1xi32, #tpu.memory_space<vmem>>, %arg3: memref<4x1x1xi32, #tpu.memory_space<vmem>>, %arg4: memref<4x1x1xi32, #tpu.memory_space<vmem>>, %arg5: memref<4x1x1xi32, #tpu.memory_space<vmem>>, %arg6: memref<4x16x160xf32, #tpu.memory_space<vmem>>, %arg7: memref<4x16x160xf32, #tpu.memory_space<vmem>>) attributes {dimension_semantics = [#tpu.dimension_semantics<parallel>, #tpu.dimension_semantics<parallel>], iteration_bounds = array<i64: 1, 1>, scalar_prefetch = 0 : i64, scratch_operands = 0 : i64, tpu.core_type = #tpu.core_type<tc>, window_params = [{transform_indices = @transform_0, window_bounds = array<i64: 4, 1, 1>}, {transform_indices = @transform_1, window_bounds = array<i64: 4, 1, 1>}, {transform_indices = @transform_2, window_bounds = array<i64: 4, 1, 1>}, {transform_indices = @transform_3, window_bounds = array<i64: 4, 1, 1>}, {transform_indices = @transform_4, window_bounds = array<i64: 4, 16, 160>}, {transform_indices = @transform_5, window_bounds = array<i64: 4, 16, 160>}]} {
    %c160_i32 = arith.constant 160 : i32
    %0 = arith.muli %arg1, %c160_i32 : i32
    %1 = tpu.iota {dimensions = array<i32: 1>} : vector<1x16x1xi32>
    %2 = tpu.iota {dimensions = array<i32: 2>} : vector<1x1x160xi32>
    %3 = vector.broadcast %0 : i32 to vector<1x1x160xi32>
    %4 = arith.addi %3, %2 : vector<1x1x160xi32>
    %c0 = arith.constant 0 : index
    %c0_0 = arith.constant 0 : index
    %c0_1 = arith.constant 0 : index
    %5 = vector.load %arg2[%c0, %c0_0, %c0_1] : memref<4x1x1xi32, #tpu.memory_space<vmem>>, vector<4x1x1xi32>
    %c0_2 = arith.constant 0 : index
    %c0_3 = arith.constant 0 : index
    %c0_4 = arith.constant 0 : index
    %6 = vector.load %arg3[%c0_2, %c0_3, %c0_4] : memref<4x1x1xi32, #tpu.memory_space<vmem>>, vector<4x1x1xi32>
    %c0_5 = arith.constant 0 : index
    %c0_6 = arith.constant 0 : index
    %c0_7 = arith.constant 0 : index
    %7 = vector.load %arg4[%c0_5, %c0_6, %c0_7] : memref<4x1x1xi32, #tpu.memory_space<vmem>>, vector<4x1x1xi32>
    %c0_8 = arith.constant 0 : index
    %c0_9 = arith.constant 0 : index
    %c0_10 = arith.constant 0 : index
    %8 = vector.load %arg5[%c0_8, %c0_9, %c0_10] : memref<4x1x1xi32, #tpu.memory_space<vmem>>, vector<4x1x1xi32>
    %9 = vector.broadcast %1 : vector<1x16x1xi32> to vector<4x16x1xi32>
    %10 = vector.broadcast %5 : vector<4x1x1xi32> to vector<4x16x1xi32>
    %11 = arith.cmpi sge, %9, %10 : vector<4x16x1xi32>
    %12 = arith.addi %5, %6 : vector<4x1x1xi32>
    %13 = vector.broadcast %1 : vector<1x16x1xi32> to vector<4x16x1xi32>
    %14 = vector.broadcast %12 : vector<4x1x1xi32> to vector<4x16x1xi32>
    %15 = arith.cmpi slt, %13, %14 : vector<4x16x1xi32>
    %16 = arith.andi %11, %15 : vector<4x16x1xi1>
    %17 = vector.broadcast %4 : vector<1x1x160xi32> to vector<4x1x160xi32>
    %18 = vector.broadcast %7 : vector<4x1x1xi32> to vector<4x1x160xi32>
    %19 = arith.cmpi sge, %17, %18 : vector<4x1x160xi32>
    %20 = arith.addi %7, %8 : vector<4x1x1xi32>
    %21 = vector.broadcast %4 : vector<1x1x160xi32> to vector<4x1x160xi32>
    %22 = vector.broadcast %20 : vector<4x1x1xi32> to vector<4x1x160xi32>
    %23 = arith.cmpi slt, %21, %22 : vector<4x1x160xi32>
    %24 = arith.andi %19, %23 : vector<4x1x160xi1>
    %25 = vector.broadcast %16 : vector<4x16x1xi1> to vector<4x16x160xi1>
    %26 = vector.broadcast %24 : vector<4x1x160xi1> to vector<4x16x160xi1>
    %27 = arith.ori %25, %26 : vector<4x16x160xi1>
    %c0_11 = arith.constant 0 : index
    %c0_12 = arith.constant 0 : index
    %c0_13 = arith.constant 0 : index
    %28 = vector.load %arg6[%c0_11, %c0_12, %c0_13] : memref<4x16x160xf32, #tpu.memory_space<vmem>>, vector<4x16x160xf32>
    %cst = arith.constant 0.000000e+00 : f32
    %29 = vector.broadcast %cst : f32 to vector<4x16x160xf32>
    %30 = arith.select %27, %29, %28 : vector<4x16x160xi1>, vector<4x16x160xf32>
    %c0_14 = arith.constant 0 : index
    %c0_15 = arith.constant 0 : index
    %c0_16 = arith.constant 0 : index
    %31 = vector.load %arg7[%c0_14, %c0_15, %c0_16] : memref<4x16x160xf32, #tpu.memory_space<vmem>>, vector<4x16x160xf32>
    tpu.vector_store %arg7[%c0_14, %c0_15, %c0_16], %30 {strides = array<i32>} : memref<4x16x160xf32, #tpu.memory_space<vmem>>, vector<4x16x160xf32>,
    return
  }
  func.func @transform_0(%arg0: i32, %arg1: i32) -> (i32, i32, i32) {
    %c0_i32 = arith.constant 0 : i32
    %c0_i32_0 = arith.constant 0 : i32
    %c0_i32_1 = arith.constant 0 : i32
    return %arg0, %c0_i32, %c0_i32_0 : i32, i32, i32
  }
  func.func @transform_1(%arg0: i32, %arg1: i32) -> (i32, i32, i32) {
    %c0_i32 = arith.constant 0 : i32
    %c0_i32_0 = arith.constant 0 : i32
    %c0_i32_1 = arith.constant 0 : i32
    return %arg0, %c0_i32, %c0_i32_0 : i32, i32, i32
  }
  func.func @transform_2(%arg0: i32, %arg1: i32) -> (i32, i32, i32) {
    %c0_i32 = arith.constant 0 : i32
    %c0_i32_0 = arith.constant 0 : i32
    %c0_i32_1 = arith.constant 0 : i32
    return %arg0, %c0_i32, %c0_i32_0 : i32, i32, i32
  }
  func.func @transform_3(%arg0: i32, %arg1: i32) -> (i32, i32, i32) {
    %c0_i32 = arith.constant 0 : i32
    %c0_i32_0 = arith.constant 0 : i32
    %c0_i32_1 = arith.constant 0 : i32
    return %arg0, %c0_i32, %c0_i32_0 : i32, i32, i32
  }
  func.func @transform_4(%arg0: i32, %arg1: i32) -> (i32, i32, i32) {
    %c0_i32 = arith.constant 0 : i32
    %c0_i32_0 = arith.constant 0 : i32
    return %arg0, %c0_i32, %arg1 : i32, i32, i32
  }
  func.func @transform_5(%arg0: i32, %arg1: i32) -> (i32, i32, i32) {
    %c0_i32 = arith.constant 0 : i32
    %c0_i32_0 = arith.constant 0 : i32
    return %arg0, %c0_i32, %arg1 : i32, i32, i32
  }
}

</mosaic_0001>

<bundles_post_ra>
// kernel: tpu_custom_call.1
= control target key start
LH: loop header
LB: loop body
LE: loop exit
PB: predicated region body
PF: predicated region fallthrough
CT: control target
= control target key end

     0   :  { %10 = vsyncpa [#allocation3], 0  ;;  %s683_s0 = inlined_call_operand.vmem [shape: s32[4,1,1], index: 0, kind: input, shape index: {}]   ;;  %s684_s1 = inlined_call_operand.vmem [shape: s32[4,1,1], index: 1, kind: input, shape index: {}]   ;;  %s685_s2 = inlined_call_operand.vmem [shape: s32[4,1,1], index: 2, kind: input, shape index: {}]   ;;  %s686_s3 = inlined_call_operand.vmem [shape: s32[4,1,1], index: 3, kind: input, shape index: {}]   ;;  %s687_s4 = inlined_call_operand.hbm [shape: f32[4,16,160], index: 4, kind: input, shape index: {}]   ;;  %s688_s5 = inlined_call_operand.hbm [shape: f32[4,16,160], index: 5, kind: output, shape index: {}]  }
   0x1   :  { %11 = vsyncpa [#allocation4], 0  ;;  %s24_s20 = sshll.u32 %s687_s4, 4  ;;  %s363_s21 = smov [#allocation2]   ;;  %s25_s20 = int_to_ptr.hbm [resolvable:$true] %s24_s20 }
   0x2   :  { %s26_s22 = sshll.u32 %s363_s21, 4  ;;  %s364_s23 = smov 256   ;;  %s27_s22 = int_to_ptr.vmem [resolvable:$true] %s26_s22 }
   0x3   :  { %s365_s24 = smov 16  }
   0x4   :  { %32 = dma.hbm_to_vmem [thread:$0]  %s25_s20, 2048, %s27_s22, [#allocation3], %s364_s23, %s364_s23, %s365_s24  }
   0x5   :  { %359 = dma.done.wait [#allocation3], 2048  }
   0x6   :  { %360 = vsyncadd [#allocation3], 4294965248  ;;  %v366_v0 = vmov 0   ;;  %v57_v1 = vld [vmem:[%s685_s2 + $0x2] sm:$0x1]  ;;  %v38_v6 = vlaneseq  ;;  %v702_v52 = vmov 0 }
   0x7   :  { %305 = vset.pattern.permute.xlu1 %v366_v0  ;;  %304 = vset.pattern.permute.xlu0 %v366_v0  ;;  %v55_v2 = vld [vmem:[%s685_s2] sm:$0x1]  ;;  %v48_v9 = vld [vmem:[%s683_s0 + $0x1] sm:$0x1]  ;;  %v58_v13 = vld [vmem:[%s685_s2 + $0x3] sm:$0x1] }
   0x8   :  { %306 = vset.pattern.permute.xlu2 %v366_v0  ;;  %108 = vperm.xlu1 %305, %v57_v1   ;;  %v59_v3 = vld [vmem:[%s686_s3] sm:$0x1]  ;;  %v52_v10 = vld [vmem:[%s684_s1 + $0x1] sm:$0x1]  ;;  %v39_v14 = vshrl.u32 %v38_v6, 7  ;;  %v477_v46 = vand.u32 127, %v38_v6 }
   0x9   :  { %100 = vperm.xlu0 %304, %v55_v2   ;;  %v123_v4 = vadd.s32 %v59_v3, %v55_v2  ;;  %v47_v5 = vld [vmem:[%s683_s0] sm:$0x1]  ;;  %v56_v11 = vld [vmem:[%s685_s2 + $0x1] sm:$0x1]  ;;  %v76_v17 = vadd.s32 %v52_v10, %v48_v9  ;;  %v61_v19 = vld [vmem:[%s686_s3 + $0x2] sm:$0x1] }
   0xa   :  { %v51_v7 = vld [vmem:[%s684_s1] sm:$0x1]  ;;  %v60_v12 = vld [vmem:[%s686_s3 + $0x1] sm:$0x1]  ;;  %v62_v20 = vld [vmem:[%s686_s3 + $0x3] sm:$0x1]  ;;  %v125_v26 = vadd.s32 %v61_v19, %v57_v1 }
   0xb   :  { %128 = vperm.xlu2 %306, %v123_v4   ;;  %v75_v8 = vadd.s32 %v51_v7, %v47_v5  ;;  %v307_v15 = vld [vmem:[%s683_s0] ss:$0 sm:$0xff]  ;;  %v124_v18 = vadd.s32 %v60_v12, %v56_v11  ;;  %v308_v21 = vld [vmem:[%s683_s0 + $0x1] ss:$0 sm:$0xff]  ;;  %v80_v22 = vperm.slane %v76_v17, 0  ;;  %v40_v23 = vadd.s32 8, %v39_v14 }
   0xc   :  { %vm67_vm0 = vcmp.ge.s32.totalorder %v39_v14, %v307_v15  ;;  %v49_v24 = vld [vmem:[%s683_s0 + $0x2] sm:$0x1]  ;;  %v126_v27 = vadd.s32 %v62_v20, %v58_v13  ;;  %vm69_vm3 = vcmp.ge.s32.totalorder %v39_v14, %v308_v21  ;;  %v50_v29 = vld [vmem:[%s683_s0 + $0x3] sm:$0x1]  ;;  %v480_v48 = vadd.s32 128, %v477_v46  ;;  %v232_v59 = vld [vmem:[#allocation2 + $0x8] sm:$0xff] }
   0xd   :  { %v79_v16 = vperm.slane %v75_v8, 0  ;;  %v53_v25 = vld [vmem:[%s684_s1 + $0x2] sm:$0x1]  ;;  %vm85_vm4 = vcmp.lt.s32.totalorder %v39_v14, %v80_v22  ;;  %vm68_vm5 = vcmp.ge.s32.totalorder %v40_v23, %v307_v15  ;;  %v54_v30 = vld [vmem:[%s684_s1 + $0x3] sm:$0x1]  ;;  %vm70_vm9 = vcmp.ge.s32.totalorder %v40_v23, %v308_v21  ;;  %v237_v6 = vld [vmem:[#allocation2 + $0x30] sm:$0xff] }
   0xe   :  { %v77_v28 = vadd.s32 %v53_v25, %v49_v24  ;;  %vm93_vm7 = vmand %vm69_vm3, %vm85_vm4  ;;  %vm86_vm10 = vcmp.lt.s32.totalorder %v40_v23, %v80_v22  ;;  %v309_v32 = vld [vmem:[%s683_s0 + $0x2] ss:$0 sm:$0xff]  ;;  %v78_v34 = vadd.s32 %v54_v30, %v50_v29  ;;  %v310_v37 = vld [vmem:[%s683_s0 + $0x3] ss:$0 sm:$0xff]  ;;  %v704_v54 = vmov 0  ;;  %s367_s0 = smov [#allocation5]  }
   0xf   :  { %vm83_vm1 = vcmp.lt.s32.totalorder %v39_v14, %v79_v16  ;;  %vm84_vm6 = vcmp.lt.s32.totalorder %v40_v23, %v79_v16  ;;  %v161_v35 = vsel %vm93_vm7, 1, %v366_v0  ;;  %vm94_vm11 = vmand %vm70_vm9, %vm86_vm10  ;;  %vm72_vm12 = vcmp.ge.s32.totalorder %v40_v23, %v309_v32  ;;  %v231_v57 = vld [vmem:[#allocation2] sm:$0xff]  ;;  %v238_v7 = vld [vmem:[#allocation2 + $0x38] sm:$0xff]  ;;  %s284_s12 = sshll.u32 %s367_s0, 4  ;;  %s286_s15 = sshll.u32 %s688_s5, 4  ;;  %s285_s12 = int_to_ptr.vmem [resolvable:$true] %s284_s12  ;;  %s287_s15 = int_to_ptr.hbm [resolvable:$true] %s286_s15 }
  0x10   :  { %112 = vperm.xlu1 %305, %v58_v13   ;;  %vm91_vm2 = vmand %vm67_vm0, %vm83_vm1  ;;  %v81_v33 = vperm.slane %v77_v28, 0  ;;  %v82_v38 = vperm.slane %v78_v34, 0  ;;  %vm71_vm14 = vcmp.ge.s32.totalorder %v39_v14, %v309_v32  ;;  %v162_v39 = vsel %vm94_vm11, 1, %v366_v0  ;;  %v243_v19 = vld [vmem:[#allocation2 + $0x60] sm:$0xff]  ;;  %v244_v20 = vld [vmem:[#allocation2 + $0x68] sm:$0xff] }
  0x11   :  { %104 = vperm.xlu0 %304, %v56_v11   ;;  %v159_v31 = vsel %vm91_vm2, 1, %v366_v0  ;;  %vm92_vm8 = vmand %vm68_vm5, %vm84_vm6  ;;  %vm73_vm2 = vcmp.ge.s32.totalorder %v39_v14, %v310_v37  ;;  %vm74_vm5 = vcmp.ge.s32.totalorder %v40_v23, %v310_v37  ;;  %v706_v55 = vmov 0  ;;  %v235_v21 = vld [vmem:[#allocation2 + $0x20] sm:$0xff]  ;;  %v236_v25 = vld [vmem:[#allocation2 + $0x28] sm:$0xff] }
  0x12   :  { %v160_v36 = vsel %vm92_vm8, 1, %v366_v0  ;;  %vm88_vm13 = vcmp.lt.s32.totalorder %v40_v23, %v81_v33  ;;  %vm87_vm15 = vcmp.lt.s32.totalorder %v39_v14, %v81_v33  ;;  %vm89_vm3 = vcmp.lt.s32.totalorder %v39_v14, %v82_v38 }
  0x13   :  { %132 = vperm.xlu2 %306, %v124_v18   ;;  %vm96_vm0 = vmand %vm72_vm12, %vm88_vm13  ;;  %vm90_vm6 = vcmp.lt.s32.totalorder %v40_v23, %v82_v38  ;;  %v708_v56 = vmov 0  ;;  %v712_v2 = vmov 0  ;;  %v718_v14 = vmov 0 }
  0x14   :  { %vm95_vm1 = vmand %vm71_vm14, %vm87_vm15  ;;  %v164_v40 = vsel %vm96_vm0, 1, %v366_v0  ;;  %vm691_vm15 = vcmask 261120  }
  0x15   :  { %v163_v41 = vsel %vm95_vm1, 1, %v366_v0  ;;  %vm97_vm4 = vmand %vm73_vm2, %vm89_vm3 }
  0x16   :  { %v165_v42 = vsel %vm97_vm4, 1, %v366_v0  ;;  %vm98_vm7 = vmand %vm74_vm5, %vm90_vm6 }
  0x17   :  { %v166_v43 = vsel %vm98_vm7, 1, %v366_v0 }
  0x18   :  { %140 = vperm.xlu1 %305, %v126_v27   ;;  %v233_v27 = vld [vmem:[#allocation2 + $0x10] sm:$0xff] }
  0x19   :  { %136 = vperm.xlu0 %304, %v125_v26  }
  0x1b   :  { %168 = vperm.xlu2 %306, %v159_v31   ;;  %v234_v31 = vld [vmem:[#allocation2 + $0x18] sm:$0xff] }
  0x20   :  { %174 = vperm.xlu1 %305, %v161_v35  }
  0x21   :  { %171 = vperm.xlu0 %304, %v160_v36  }
  0x23   :  { %177 = vperm.xlu2 %306, %v162_v39   ;;  %v241_v39 = vld [vmem:[#allocation2 + $0x50] sm:$0xff] }
  0x28   :  { %183 = vperm.xlu1 %305, %v164_v40  }
  0x29   :  { %180 = vperm.xlu0 %304, %v163_v41  }
  0x2b   :  { %186 = vperm.xlu2 %306, %v165_v42   ;;  %v242_v42 = vld [vmem:[#allocation2 + $0x58] sm:$0xff] }
  0x31   :  { %189 = vperm.xlu0 %304, %v166_v43   ;;  %v239_v43 = vld [vmem:[#allocation2 + $0x40] sm:$0xff] }
  0x65   :  { %v129_v44 = vpop.permute.xlu2 %128 }
  0x66   :  { %v130_v47 = vperm.slane %v129_v44, 0 }
  0x68   :  { %vm485_vm8 = vcmp.lt.s32.totalorder %v477_v46, %v130_v47  ;;  %vm490_vm9 = vcmp.lt.s32.totalorder %v480_v48, %v130_v47 }
  0x69   :  { %v703_v52 = vsel %vm485_vm8, 4294967295, %v702_v52  ;;  %v705_v54 = vsel %vm490_vm9, 4294967295, %v704_v54 }
  0x6d   :  { %v133_v45 = vpop.permute.xlu2 %132 }
  0x6e   :  { %v134_v58 = vperm.slane %v133_v45, 0  ;;  %v240_v45 = vld [vmem:[#allocation2 + $0x48] sm:$0xff] }
  0x70   :  { %vm523_vm2 = vcmp.lt.s32.totalorder %v477_v46, %v134_v58  ;;  %vm529_vm3 = vcmp.lt.s32.totalorder %v480_v48, %v134_v58 }
  0x71   :  { %v713_v2 = vsel %vm529_vm3, 4294967295, %v712_v2 }
  0x75   :  { %v169_v49 = vpop.permute.xlu2 %168 }
  0x76   :  { %vm191_vm10 = vcmp.eq.s32.totalorder %v169_v49, 1  ;;  %v245_v49 = vld [vmem:[#allocation2 + $0x70] sm:$0xff] }
  0x7a   :  { %v482_v50 = vpop.permute.xlu1 %108 }
  0x7b   :  { %v101_v51 = vpop.permute.xlu0 %100  ;;  %v110_v29 = vperm.slane %v482_v50, 0 }
  0x7c   :  { %v102_v53 = vperm.slane %v101_v51, 0  ;;  %v246_v51 = vld [vmem:[#allocation2 + $0x78] sm:$0xff] }
  0x7d   :  { %v178_v3 = vpop.permute.xlu2 %177 }
  0x7e   :  { %vm495_vm11 = vcmp.ge.s32.totalorder %v477_v46, %v102_v53  ;;  %vm500_vm12 = vcmp.ge.s32.totalorder %v480_v48, %v102_v53  ;;  %vm194_vm7 = vcmp.eq.s32.totalorder %v178_v3, 1 }
  0x7f   :  { %v707_v55 = vsel %vm495_vm11, 4294967295, %v706_v55  ;;  %v709_v56 = vsel %vm500_vm12, 4294967295, %v708_v56  ;;  %vm690_vm13 = vmand %vm495_vm11, %vm485_vm8 }
  0x80   :  { %vm689_vm14 = vmand %vm500_vm12, %vm490_vm9 }
  0x81   :  { %vm215_vm0 = vmor %vm191_vm10, %vm690_vm13 }
  0x82   :  { %vm216_vm1 = vmor %vm191_vm10, %vm689_vm14  ;;  %v247_v60 = vsel %vm215_vm0, 0.0, %v231_v57  ;;  %v113_v61 = vpop.permute.xlu1 %112 }
  0x83   :  { %v105_v62 = vpop.permute.xlu0 %104  ;;  %v248_v63 = vsel %vm216_vm1, 0.0, %v232_v59  ;;  %263 = vst [vmem:[#allocation5] sm:$0xff] %v247_v60  ;;  %v114_v12 = vperm.slane %v113_v61, 0 }
  0x84   :  { %v106_v1 = vperm.slane %v105_v62, 0  ;;  %265 = vst.msk [vmem:[#allocation5 + $0x8] sm:$0xff] %vm691_vm15, %v248_v63 }
  0x85   :  { %v187_v15 = vpop.permute.xlu2 %186 }
  0x86   :  { %vm534_vm4 = vcmp.ge.s32.totalorder %v477_v46, %v106_v1  ;;  %vm539_vm5 = vcmp.ge.s32.totalorder %v480_v48, %v106_v1 }
  0x87   :  { %vm693_vm6 = vmand %vm534_vm4, %vm523_vm2 }
  0x88   :  { %vm692_vm10 = vmand %vm539_vm5, %vm529_vm3 }
  0x89   :  { %vm221_vm0 = vmor %vm194_vm7, %vm693_vm6 }
  0x8a   :  { %vm222_vm1 = vmor %vm194_vm7, %vm692_vm10  ;;  %v253_v8 = vsel %vm221_vm0, 0.0, %v237_v6  ;;  %v141_v9 = vpop.permute.xlu1 %140  ;;  %vm573_vm7 = vcmp.ge.s32.totalorder %v477_v46, %v114_v12  ;;  %vm578_vm0 = vcmp.ge.s32.totalorder %v480_v48, %v114_v12 }
  0x8b   :  { %v137_v10 = vpop.permute.xlu0 %136  ;;  %v254_v11 = vsel %vm222_vm1, 0.0, %v238_v7  ;;  %270 = vst [vmem:[#allocation5 + $0x30] sm:$0xff] %v253_v8  ;;  %v142_v13 = vperm.slane %v141_v9, 0  ;;  %vm726_vm11 = vmand %vm534_vm4, %vm523_vm2  ;;  %vm730_vm2 = vnez %v707_v55 }
  0x8c   :  { %271 = vst.msk [vmem:[#allocation5 + $0x38] sm:$0xff] %vm691_vm15, %v254_v11  ;;  %vm197_vm15 = vcmp.eq.s32.totalorder %v187_v15, 1  ;;  %v138_v24 = vperm.slane %v137_v10, 0 }
  0x8d   :  { %vm563_vm14 = vcmp.lt.s32.totalorder %v477_v46, %v142_v13  ;;  %vm568_vm13 = vcmp.lt.s32.totalorder %v480_v48, %v142_v13 }
  0x8e   :  { %v719_v14 = vsel %vm563_vm14, 4294967295, %v718_v14  ;;  %vm699_vm1 = vmand %vm573_vm7, %vm563_vm14 }
  0x8f   :  { %vm701_vm10 = vmand %vm578_vm0, %vm568_vm13 }
  0x90   :  { %vm227_vm6 = vmor %vm197_vm15, %vm699_vm1  ;;  %vm727_vm1 = vnez %v713_v2 }
  0x91   :  { %vm228_vm8 = vmor %vm197_vm15, %vm701_vm10  ;;  %v259_v26 = vsel %vm227_vm6, 0.0, %v243_v19  ;;  %vm729_vm15 = vcmask 261120   ;;  %vm619_vm10 = vcmp.lt.s32.totalorder %v477_v46, %v138_v24 }
  0x92   :  { %v175_v22 = vpop.permute.xlu1 %174  ;;  %v260_v28 = vsel %vm228_vm8, 0.0, %v244_v20  ;;  %276 = vst [vmem:[#allocation5 + $0x60] sm:$0xff] %v259_v26  ;;  %vm728_vm12 = vmand %vm539_vm5, %vm727_vm1 }
  0x93   :  { %v172_v23 = vpop.permute.xlu0 %171  ;;  %vm193_vm9 = vcmp.eq.s32.totalorder %v175_v22, 1  ;;  %277 = vst.msk [vmem:[#allocation5 + $0x68] sm:$0xff] %vm729_vm15, %v260_v28  ;;  %vm736_vm5 = vmmov %vm729_vm15  ;;  %vm631_vm15 = vcmp.lt.s32.totalorder %v480_v48, %v138_v24 }
  0x94   :  { %vm219_vm3 = vmor %vm193_vm9, %vm726_vm11  ;;  %vm731_vm11 = vnez %v703_v52  ;;  %vm733_vm4 = vcmp.eq.s32.totalorder %v172_v23, 1 }
  0x95   :  { %vm220_vm14 = vmor %vm193_vm9, %vm728_vm12  ;;  %v251_v30 = vsel %vm219_vm3, 0.0, %v235_v21  ;;  %vm737_vm9 = vnez %v709_v56  ;;  %vm738_vm12 = vnez %v705_v54 }
  0x96   :  { %v252_v32 = vsel %vm220_vm14, 0.0, %v236_v25  ;;  %268 = vst [vmem:[#allocation5 + $0x20] sm:$0xff] %v251_v30  ;;  %vm732_vm8 = vmand %vm730_vm2, %vm731_vm11  ;;  %vm636_vm2 = vcmp.ge.s32.totalorder %v477_v46, %v110_v29 }
  0x97   :  { %vm217_vm6 = vmor %vm733_vm4, %vm732_vm8  ;;  %269 = vst.msk [vmem:[#allocation5 + $0x28] sm:$0xff] %vm736_vm5, %v252_v32  ;;  %vm642_vm8 = vcmp.ge.s32.totalorder %v480_v48, %v110_v29 }
  0x98   :  { %vm739_vm14 = vmand %vm737_vm9, %vm738_vm12  ;;  %v249_v34 = vsel %vm217_vm6, 0.0, %v233_v27 }
  0x99   :  { %vm740_vm3 = vmmov %vm733_vm4  ;;  %266 = vst [vmem:[#allocation5 + $0x10] sm:$0xff] %v249_v34 }
  0x9a   :  { %vm218_vm1 = vmor %vm740_vm3, %vm739_vm14  ;;  %v184_v40 = vpop.permute.xlu1 %183 }
  0x9b   :  { %v250_v36 = vsel %vm218_vm1, 0.0, %v234_v31  ;;  %vm745_vm11 = vmmov %vm736_vm5  ;;  %v181_v41 = vpop.permute.xlu0 %180  ;;  %vm196_vm5 = vcmp.eq.s32.totalorder %v184_v40, 1 }
  0x9c   :  { %267 = vst.msk [vmem:[#allocation5 + $0x18] sm:$0xff] %vm745_vm11, %v250_v36  ;;  %vm155_vm4 = vmand %vm636_vm2, %vm619_vm10  ;;  %vm195_vm9 = vcmp.eq.s32.totalorder %v181_v41, 1  ;;  %vm750_vm10 = vnez %v719_v14 }
  0x9d   :  { %vm156_vm6 = vmand %vm642_vm8, %vm631_vm15 }
  0x9e   :  { %vm225_vm12 = vmor %vm196_vm5, %vm155_vm4 }
  0x9f   :  { %vm226_vm14 = vmor %vm196_vm5, %vm156_vm6  ;;  %v257_v44 = vsel %vm225_vm12, 0.0, %v241_v39 }
  0xa0   :  { %v258_v46 = vsel %vm226_vm14, 0.0, %v242_v42  ;;  %274 = vst [vmem:[#allocation5 + $0x50] sm:$0xff] %v257_v44  ;;  %vm223_vm3 = vmor %vm195_vm9, %vm155_vm4 }
  0xa1   :  { %vm748_vm1 = vmmov %vm745_vm11  ;;  %v255_v47 = vsel %vm223_vm3, 0.0, %v239_v43 }
  0xa2   :  { %275 = vst.msk [vmem:[#allocation5 + $0x58] sm:$0xff] %vm748_vm1, %v258_v46  ;;  %vm224_vm15 = vmor %vm195_vm9, %vm156_vm6 }
  0xa3   :  { %v256_v48 = vsel %vm224_vm15, 0.0, %v240_v45  ;;  %272 = vst [vmem:[#allocation5 + $0x40] sm:$0xff] %v255_v47  ;;  %vm749_vm11 = vmmov %vm748_vm1  ;;  %v190_v50 = vpop.permute.xlu0 %189 }
  0xa4   :  { %273 = vst.msk [vmem:[#allocation5 + $0x48] sm:$0xff] %vm749_vm11, %v256_v48  ;;  %vm198_vm8 = vcmp.eq.s32.totalorder %v190_v50, 1  ;;  %vm751_vm2 = vmand %vm573_vm7, %vm750_vm10 }
  0xa5   :  { %vm229_vm4 = vmor %vm198_vm8, %vm751_vm2 }
  0xa6   :  { %vm752_vm6 = vmand %vm578_vm0, %vm568_vm13  ;;  %v261_v52 = vsel %vm229_vm4, 0.0, %v245_v49 }
  0xa7   :  { %vm230_vm5 = vmor %vm198_vm8, %vm752_vm6  ;;  %278 = vst [vmem:[#allocation5 + $0x70] sm:$0xff] %v261_v52 }
  0xa8   :  { %v262_v53 = vsel %vm230_vm5, 0.0, %v246_v51  ;;  %vm753_vm9 = vmmov %vm748_vm1 }
  0xa9   :  { %279 = vst.msk [vmem:[#allocation5 + $0x78] sm:$0xff] %vm753_vm9, %v262_v53 }
  0xaa   :  { %292 = dma.vmem_to_hbm [thread:$0]  %s285_s12, 2048, %s287_s15, [#allocation4], %s364_s23, %s364_s23, %s365_s24  }
  0xab   :  { %361 = dma.done.wait [#allocation4], 2048  }
  0xac   :  { %362 = vsyncadd [#allocation4], 4294965248 }
  0xad   :  { %297 = vsyncpa [#allocation3], 1 }
  0xae   :  { %298 = vsyncpa [#allocation4], 1 }

</bundles_post_ra>
